<compile_context>
chip_gen: v5e
topology: v5e:2x2
jax: 0.10.0
libtpu: 0.0.40
codegen_flags: <defaults>
</compile_context>

<pallas_src>
import jax
import jax.numpy as jnp
from jax.experimental import pallas as pl
from jax.experimental.pallas import tpu as pltpu

# (name, num_embeddings, embedding_dim) — matches Input_Module.embed_dim
EMBED_DIM = [("month", 13, 2), ("day", 32, 2), ("hour", 25, 2), ("type", 101, 8)]

# Fused block-diagonal table layout (rows = concatenated vocabularies):
#   rows  0:13   cols 0:2   month
#   rows 13:45   cols 2:4   day
#   rows 45:70   cols 4:6   hour
#   rows 70:171  cols 6:14  type
_MONTH_OFF, _DAY_OFF, _HOUR_OFF, _TYPE_OFF = 0, 13, 45, 70
_VOCAB_TOTAL = 171            # 13 + 32 + 25 + 101
_K_PAD = 256                  # pad reduce dim to a multiple of 128 (1 MXU pass v6e/v7x)
_EMB_WIDTH = 14               # 2 + 2 + 2 + 8
_OUT_WIDTH = 5 + _EMB_WIDTH   # [train cols 1:6 | embeddings]


def _round_up(x, m):
    return (x + m - 1) // m * m


def input_module_kernel(cols_ref, table_ref, out_ref):
    """One row tile.

    cols_ref : (tile, 9)  f32 — original train columns 1:10
               cols 0:5 = loc(1:3)+property(3:6), col 5 = type, cols 6/7/8 = month/day/hour
    table_ref: (256, 14)  f32 — block-diagonal fused embedding table
    out_ref  : (tile, 19) f32 — [train_input_tensor (5) | time_type_semantic (14)]
    """
    x = cols_ref[...]                                   # (tile, 9)
    feats = x[:, 0:5]

    # .long() on non-negative integer-valued floats == truncate toward zero.
    # NOTE: out-of-range indices produce an all-zero embedding row instead of the
    # PyTorch nn.Embedding error; inputs are assumed valid.
    type_i = x[:, 5:6].astype(jnp.int32) + _TYPE_OFF    # (tile, 1)
    month_i = x[:, 6:7].astype(jnp.int32) + _MONTH_OFF
    day_i = x[:, 7:8].astype(jnp.int32) + _DAY_OFF
    hour_i = x[:, 8:9].astype(jnp.int32) + _HOUR_OFF

    tile = x.shape[0]
    iota = jax.lax.broadcasted_iota(jnp.int32, (tile, _K_PAD), 1)
    multihot = ((iota == month_i) | (iota == day_i) |
                (iota == hour_i) | (iota == type_i)).astype(jnp.float32)

    # One fused MXU matmul replaces the four tiny per-table lookups.
    emb = jnp.dot(multihot, table_ref[...], preferred_element_type=jnp.float32)  # (tile, 14)

    out_ref[...] = jnp.concatenate([feats, emb], axis=1)


def make_combined_table(params):
    """Block-diagonal (256, 14) table; off-diagonal zeros + K padding rows are zero."""
    table = jnp.zeros((_K_PAD, _EMB_WIDTH), jnp.float32)
    table = table.at[_MONTH_OFF:_MONTH_OFF + 13, 0:2].set(params["month"])
    table = table.at[_DAY_OFF:_DAY_OFF + 32, 2:4].set(params["day"])
    table = table.at[_HOUR_OFF:_HOUR_OFF + 25, 4:6].set(params["hour"])
    table = table.at[_TYPE_OFF:_TYPE_OFF + 101, 6:14].set(params["type"])
    return table


def input_module_forward(train, label, params, *, row_tile=4096):
    """Pallas port of Input_Module.forward.

    Returns (train_input_tensor (B,S,5), label_loc (B,S,2), time_type_semantic (B,S,14)).
    """
    B, S, _ = train.shape
    N = B * S

    # label_loc is a pure slice of `label`: compute it in XLA so the kernel never
    # DMAs the (80% dead) label bytes.
    label_loc = label[:, :, 1:3].astype(jnp.float32)

    # Only train columns 1:10 are consumed by the forward pass.
    cols = train[:, :, 1:10].astype(jnp.float32).reshape(N, 9)

    # Row tile: multiple of 8 sublanes. Default 4096 fits comfortably in the
    # v7x 64-MiB VMEM budget; v6e/v5e can pass a larger row_tile.
    tile = max(8, min(row_tile, _round_up(N, 8)))
    n_pad = _round_up(N, tile)
    if n_pad != N:
        # zero-padded rows index embedding row 0 (valid) and are sliced off below.
        cols = jnp.pad(cols, ((0, n_pad - N), (0, 0)))

    table = make_combined_table(params)

    out = pl.pallas_call(
        input_module_kernel,
        out_shape=jax.ShapeDtypeStruct((n_pad, _OUT_WIDTH), jnp.float32),
        grid=(n_pad // tile,),
        in_specs=[
            pl.BlockSpec((tile, 9), lambda i: (i, 0)),
            pl.BlockSpec((_K_PAD, _EMB_WIDTH), lambda i: (0, 0)),
        ],
        out_specs=pl.BlockSpec((tile, _OUT_WIDTH), lambda i: (i, 0)),
        compiler_params=pltpu.CompilerParams(
            dimension_semantics=("parallel",),
            vmem_limit_bytes=32 * 1024 * 1024,
        ),
    )(cols, table)

    out = out[:N]
    train_input = out[:, 0:5].reshape(B, S, 5)
    time_type = out[:, 5:_OUT_WIDTH].reshape(B, S, _EMB_WIDTH)
    return train_input, label_loc, time_type


def make_params(key):
    params = {}
    for i, (name, num_embeddings, embedding_dim) in enumerate(EMBED_DIM):
        k = jax.random.fold_in(key, i)
        # nn.Embedding default init ~ N(0, 1)
        params[name] = jax.random.normal(k, (num_embeddings, embedding_dim),
                                         dtype=jnp.float32)
    return params


def reference_forward(train, label, params):
    """Pure-JAX reference matching the PyTorch forward."""
    loc = train[:, :, 1:3]
    prop = train[:, :, 3:6]
    type_idx = train[:, :, 6].astype(jnp.int32)
    time_idx = train[:, :, 7:10].astype(jnp.int32)
    label_loc = label[:, :, 1:3]
    embs = [
        jnp.take(params["month"], time_idx[:, :, 0], axis=0),
        jnp.take(params["day"],   time_idx[:, :, 1], axis=0),
        jnp.take(params["hour"],  time_idx[:, :, 2], axis=0),
        jnp.take(params["type"],  type_idx,          axis=0),
    ]
    return (jnp.concatenate([loc, prop], axis=2),
            label_loc,
            jnp.concatenate(embs, axis=2))


if __name__ == "__main__":
    key = jax.random.PRNGKey(0)
    k_params, k_train, k_label, k_idx = jax.random.split(key, 4)
    params = make_params(k_params)

    def make_data(kf, ki, B, S, F=10):
        x = jax.random.normal(kf, (B, S, F), dtype=jnp.float32)
        k_m, k_d, k_h, k_t = jax.random.split(ki, 4)
        month = jax.random.randint(k_m, (B, S), 0, 13).astype(jnp.float32)
        day = jax.random.randint(k_d, (B, S), 0, 32).astype(jnp.float32)
        hour = jax.random.randint(k_h, (B, S), 0, 25).astype(jnp.float32)
        typ = jax.random.randint(k_t, (B, S), 0, 101).astype(jnp.float32)
        x = x.at[:, :, 6].set(typ)
        x = x.at[:, :, 7].set(month)
        x = x.at[:, :, 8].set(day)
        x = x.at[:, :, 9].set(hour)
        return x

    # (B, S, row_tile): small single-tile case + a case exercising the grid & row padding.
    cases = [(2, 8, 4096), (2, 600, 512)]
    for ci, (B, S, row_tile) in enumerate(cases):
        kt = jax.random.fold_in(k_train, ci)
        kl = jax.random.fold_in(k_label, ci)
        ki = jax.random.fold_in(k_idx, ci)
        train = make_data(kt, ki, B, S)
        label = make_data(kl, jax.random.fold_in(ki, 1), B, S)

        outs = input_module_forward(train, label, params, row_tile=row_tile)
        outs = jax.block_until_ready(outs)

        refs = reference_forward(train, label, params)
        for o, r in zip(outs, refs):
            assert o.shape == r.shape, (o.shape, r.shape)
            assert jnp.allclose(o, r, atol=1e-5), f"mismatch vs reference (case {ci})"

    print("KERNEL_OK")
</pallas_src>

<mosaic_0001>
module attributes {stable_mosaic.version = 11 : i64} {
  func.func @input_module_kernel(%arg0: i32, %arg1: memref<16x9xf32, #tpu.memory_space<vmem>>, %arg2: memref<256x14xf32, #tpu.memory_space<vmem>>, %arg3: memref<16x19xf32, #tpu.memory_space<vmem>>) attributes {dimension_semantics = [#tpu.dimension_semantics<parallel>], iteration_bounds = array<i64: 1>, scalar_prefetch = 0 : i64, scratch_operands = 0 : i64, tpu.core_type = #tpu.core_type<tc>, window_params = [{transform_indices = @transform_0, window_bounds = array<i64: 16, 9>}, {pipeline_mode = #tpu.pipeline_mode<synchronous>, transform_indices = @transform_1, window_bounds = array<i64: 256, 14>}, {transform_indices = @transform_2, window_bounds = array<i64: 16, 19>}]} {
    %c0 = arith.constant 0 : index
    %c0_0 = arith.constant 0 : index
    %0 = vector.load %arg1[%c0, %c0_0] : memref<16x9xf32, #tpu.memory_space<vmem>>, vector<16x9xf32>
    %1 = vector.extract_strided_slice %0 {offsets = [0, 0], sizes = [16, 5], strides = [1, 1]} : vector<16x9xf32> to vector<16x5xf32>
    %2 = vector.extract_strided_slice %0 {offsets = [0, 5], sizes = [16, 1], strides = [1, 1]} : vector<16x9xf32> to vector<16x1xf32>
    %3 = arith.fptosi %2 : vector<16x1xf32> to vector<16x1xi32>
    %c70_i32 = arith.constant 70 : i32
    %4 = vector.broadcast %c70_i32 : i32 to vector<16x1xi32>
    %5 = arith.addi %3, %4 : vector<16x1xi32>
    %6 = vector.extract_strided_slice %0 {offsets = [0, 6], sizes = [16, 1], strides = [1, 1]} : vector<16x9xf32> to vector<16x1xf32>
    %7 = arith.fptosi %6 : vector<16x1xf32> to vector<16x1xi32>
    %c0_i32 = arith.constant 0 : i32
    %8 = vector.broadcast %c0_i32 : i32 to vector<16x1xi32>
    %9 = arith.addi %7, %8 : vector<16x1xi32>
    %10 = vector.extract_strided_slice %0 {offsets = [0, 7], sizes = [16, 1], strides = [1, 1]} : vector<16x9xf32> to vector<16x1xf32>
    %11 = arith.fptosi %10 : vector<16x1xf32> to vector<16x1xi32>
    %c13_i32 = arith.constant 13 : i32
    %12 = vector.broadcast %c13_i32 : i32 to vector<16x1xi32>
    %13 = arith.addi %11, %12 : vector<16x1xi32>
    %14 = vector.extract_strided_slice %0 {offsets = [0, 8], sizes = [16, 1], strides = [1, 1]} : vector<16x9xf32> to vector<16x1xf32>
    %15 = arith.fptosi %14 : vector<16x1xf32> to vector<16x1xi32>
    %c45_i32 = arith.constant 45 : i32
    %16 = vector.broadcast %c45_i32 : i32 to vector<16x1xi32>
    %17 = arith.addi %15, %16 : vector<16x1xi32>
    %18 = tpu.iota {dimensions = array<i32: 1>} : vector<16x256xi32>
    %19 = vector.broadcast %9 : vector<16x1xi32> to vector<16x256xi32>
    %20 = arith.cmpi eq, %18, %19 : vector<16x256xi32>
    %21 = vector.broadcast %13 : vector<16x1xi32> to vector<16x256xi32>
    %22 = arith.cmpi eq, %18, %21 : vector<16x256xi32>
    %23 = arith.ori %20, %22 : vector<16x256xi1>
    %24 = vector.broadcast %17 : vector<16x1xi32> to vector<16x256xi32>
    %25 = arith.cmpi eq, %18, %24 : vector<16x256xi32>
    %26 = arith.ori %23, %25 : vector<16x256xi1>
    %27 = vector.broadcast %5 : vector<16x1xi32> to vector<16x256xi32>
    %28 = arith.cmpi eq, %18, %27 : vector<16x256xi32>
    %29 = arith.ori %26, %28 : vector<16x256xi1>
    %30 = arith.extui %29 : vector<16x256xi1> to vector<16x256xi32>
    %31 = arith.sitofp %30 : vector<16x256xi32> to vector<16x256xf32>
    %c0_1 = arith.constant 0 : index
    %c0_2 = arith.constant 0 : index
    %32 = vector.load %arg2[%c0_1, %c0_2] : memref<256x14xf32, #tpu.memory_space<vmem>>, vector<256x14xf32>
    %cst = arith.constant dense<0.000000e+00> : vector<16x14xf32>
    %33 = tpu.matmul %31, %32, %cst {dimension_numbers = #tpu.dot_dimension_numbers<[1], [0], [0], [1], [0, 0, 1, 1], [], []>} : vector<16x256xf32>, vector<256x14xf32>, vector<16x14xf32> -> vector<16x14xf32>
    %34 = tpu.concatenate %1, %33 in 1 : vector<16x5xf32>, vector<16x14xf32> -> vector<16x19xf32>
    %c0_3 = arith.constant 0 : index
    %c0_4 = arith.constant 0 : index
    %35 = vector.load %arg3[%c0_3, %c0_4] : memref<16x19xf32, #tpu.memory_space<vmem>>, vector<16x19xf32>
    tpu.vector_store %arg3[%c0_3, %c0_4], %34 {strides = array<i32>} : memref<16x19xf32, #tpu.memory_space<vmem>>, vector<16x19xf32>,
    return
  }
  func.func @transform_0(%arg0: i32) -> (i32, i32) {
    %c0_i32 = arith.constant 0 : i32
    %c0_i32_0 = arith.constant 0 : i32
    return %arg0, %c0_i32 : i32, i32
  }
  func.func @transform_1(%arg0: i32) -> (i32, i32) {
    %c0_i32 = arith.constant 0 : i32
    %c0_i32_0 = arith.constant 0 : i32
    %c0_i32_1 = arith.constant 0 : i32
    return %c0_i32, %c0_i32_0 : i32, i32
  }
  func.func @transform_2(%arg0: i32) -> (i32, i32) {
    %c0_i32 = arith.constant 0 : i32
    %c0_i32_0 = arith.constant 0 : i32
    return %arg0, %c0_i32 : i32, i32
  }
}

</mosaic_0001>

<bundles_post_ra>
// kernel: tpu_custom_call.1
= control target key start
LH: loop header
LB: loop body
LE: loop exit
PB: predicated region body
PF: predicated region fallthrough
CT: control target
= control target key end

     0   :  { %v289_v2 = vmov 6   ;;  %v290_v5 = vmov 8   ;;  %s432_s0 = inlined_call_operand.vmem [shape: f32[16,9], index: 0, kind: input, shape index: {}]   ;;  %s433_s1 = inlined_call_operand.vmem [shape: f32[256,14], index: 1, kind: input, shape index: {}]   ;;  %s434_s2 = inlined_call_operand.hbm [shape: f32[16,19], index: 2, kind: output, shape index: {}]  }
   0x1   :  { %v316_v0 = vld [vmem:[%s432_s0 + $0x8] sm:$0xff]  ;;  %v321_v1 = vld [vmem:[%s432_s0] sm:$0xff]  ;;  %254 = vset.pattern.permute.xlu0 %v289_v2  ;;  %257 = vset.pattern.permute.xlu1 %v290_v5  ;;  %v100_v6 = vld [vmem:[%s433_s1 + $0x78] sm:$0xff] }
   0x2   :  { %vm240_vm0 = vcmp.lt.s32.totalorder %v316_v0, 0  ;;  %v241_v3 = vceil.f32 %v316_v0  ;;  %v242_v4 = vfloor.f32 %v316_v0  ;;  %vm235_vm1 = vcmp.lt.s32.totalorder %v321_v1, 0  ;;  %v116_v7 = vld [vmem:[%s433_s1 + $0xf8] sm:$0xff]  ;;  %v99_v8 = vld [vmem:[%s433_s1 + $0x70] sm:$0xff]  ;;  %256 = vset.pattern.permute.xlu2 %v289_v2  ;;  %203 = vmatpush.msra.mxu2 %v100_v6  ;;  %v98_v13 = vld [vmem:[%s433_s1 + $0x68] sm:$0xff] }
   0x3   :  { %v236_v9 = vceil.f32 %v321_v1  ;;  %v237_v10 = vfloor.f32 %v321_v1  ;;  %v115_v11 = vld [vmem:[%s433_s1 + $0xf0] sm:$0xff]  ;;  %219 = vmatpush.msra.mxu3 %v116_v7  ;;  %117 = vmatpush.msra.mxu0 %v100_v6  ;;  %v114_v16 = vld [vmem:[%s433_s1 + $0xe8] sm:$0xff]  ;;  %v97_v18 = vld [vmem:[%s433_s1 + $0x60] sm:$0xff] }
   0x4   :  { %v243_v12 = vsel %vm240_vm0, %v241_v3, %v242_v4  ;;  %204 = vmatpush.msra.mxu2 %v99_v8  ;;  %140 = vmatpush.msra.mxu1 %v116_v7 }
   0x5   :  { %v244_v14 = vcvt.f32.s32 %v243_v12  ;;  %v238_v15 = vsel %vm235_vm1, %v236_v9, %v237_v10  ;;  %220 = vmatpush.msra.mxu3 %v115_v11  ;;  %118 = vmatpush.msra.mxu0 %v99_v8 }
   0x6   :  { %v239_v17 = vcvt.f32.s32 %v238_v15 }
   0x7   :  { %7 = vsyncpa [#allocation3], 0  ;;  %29 = vperm.xlu0 %254, %v244_v14   ;;  %v21_v19 = vadd.s32 45, %v244_v14  ;;  %205 = vmatpush.msra.mxu2 %v98_v13  ;;  %v113_v20 = vld [vmem:[%s433_s1 + $0xe0] sm:$0xff]  ;;  %v96_v21 = vld [vmem:[%s433_s1 + $0x58] sm:$0xff]  ;;  %v19_v25 = vadd.s32 13, %v244_v14  ;;  %v22_v52 = vlaneseq }
   0x8   :  { %26 = vperm.xlu2 %256, %v239_v17   ;;  %221 = vmatpush.msra.mxu3 %v114_v16  ;;  %v112_v22 = vld [vmem:[%s433_s1 + $0xd8] sm:$0xff]  ;;  %v95_v23 = vld [vmem:[%s433_s1 + $0x50] sm:$0xff]  ;;  %v94_v26 = vld [vmem:[%s433_s1 + $0x48] sm:$0xff]  ;;  %v18_v27 = vadd.s32 13, %v239_v17  ;;  %v17_v28 = vadd.s32 70, %v244_v14  ;;  %v291_v29 = vmov 7  }
   0x9   :  { %53 = vperm.xlu1 %257, %v21_v19   ;;  %206 = vmatpush.msra.mxu2 %v97_v18  ;;  %v111_v24 = vld [vmem:[%s433_s1 + $0xd0] sm:$0xff]  ;;  %v110_v30 = vld [vmem:[%s433_s1 + $0xc8] sm:$0xff]  ;;  %v292_v31 = vmov 5   ;;  %v16_v32 = vadd.s32 70, %v239_v17  ;;  %v20_v33 = vadd.s32 45, %v239_v17  ;;  %v93_v34 = vld [vmem:[%s433_s1 + $0x40] sm:$0xff] }
   0xa   :  { %222 = vmatpush.msra.mxu3 %v113_v20  ;;  %141 = vmatpush.msra.mxu1 %v115_v11  ;;  %v109_v35 = vld [vmem:[%s433_s1 + $0xc0] sm:$0xff]  ;;  %v92_v36 = vld [vmem:[%s433_s1 + $0x38] sm:$0xff]  ;;  %v91_v38 = vld [vmem:[%s433_s1 + $0x30] sm:$0xff]  ;;  %v23_v56 = vand.u32 127, %v22_v52  ;;  %v293_v61 = vmov 1.0   ;;  %s295_s18 = smov [#allocation2]  }
   0xb   :  { %207 = vmatpush.msra.mxu2 %v96_v21  ;;  %119 = vmatpush.msra.mxu0 %v98_v13  ;;  %v108_v37 = vld [vmem:[%s433_s1 + $0xb8] sm:$0xff]  ;;  %v107_v39 = vld [vmem:[%s433_s1 + $0xb0] sm:$0xff]  ;;  %v90_v40 = vld [vmem:[%s433_s1 + $0x28] sm:$0xff]  ;;  %s181_s19 = sshll.u32 %s295_s18, 4  ;;  %s183_s22 = sshll.u32 %s434_s2, 4  ;;  %s182_s19 = int_to_ptr.vmem [resolvable:$true] %s181_s19  ;;  %s184_s22 = int_to_ptr.hbm [resolvable:$true] %s183_s22 }
   0xc   :  { %223 = vmatpush.msra.mxu3 %v112_v22  ;;  %142 = vmatpush.msra.mxu1 %v114_v16  ;;  %v106_v41 = vld [vmem:[%s433_s1 + $0xa8] sm:$0xff]  ;;  %v89_v42 = vld [vmem:[%s433_s1 + $0x20] sm:$0xff]  ;;  %v88_v44 = vld [vmem:[%s433_s1 + $0x18] sm:$0xff]  ;;  %v24_v57 = vadd.s32 128, %v23_v56  ;;  %s296_s23 = smov 128   ;;  %s297_s24 = smov 8  }
   0xd   :  { %208 = vmatpush.msra.mxu2 %v95_v23  ;;  %120 = vmatpush.msra.mxu0 %v97_v18  ;;  %v105_v43 = vld [vmem:[%s433_s1 + $0xa0] sm:$0xff]  ;;  %v104_v45 = vld [vmem:[%s433_s1 + $0x98] sm:$0xff]  ;;  %v87_v46 = vld [vmem:[%s433_s1 + $0x10] sm:$0xff] }
   0xe   :  { %224 = vmatpush.msra.mxu3 %v111_v24  ;;  %143 = vmatpush.msra.mxu1 %v113_v20  ;;  %v103_v47 = vld [vmem:[%s433_s1 + $0x90] sm:$0xff]  ;;  %v86_v48 = vld [vmem:[%s433_s1 + $0x8] sm:$0xff]  ;;  %v85_v50 = vld [vmem:[%s433_s1] sm:$0xff] }
   0xf   :  { %255 = vset.pattern.permute.xlu0 %v291_v29  ;;  %209 = vmatpush.msra.mxu2 %v94_v26  ;;  %v102_v49 = vld [vmem:[%s433_s1 + $0x88] sm:$0xff]  ;;  %v101_v51 = vld [vmem:[%s433_s1 + $0x80] sm:$0xff]  ;;  %s294_s1 = smov 5  }
  0x10   :  { %39 = vperm.xlu0 %255, %v19_v25   ;;  %259 = vset.pattern.permute.xlu2 %v291_v29 }
  0x11   :  { %258 = vset.pattern.permute.xlu1 %v292_v31  ;;  %36 = vperm.xlu2 %259, %v18_v27  }
  0x12   :  { %67 = vperm.xlu1 %258, %v17_v28   ;;  %225 = vmatpush.msra.mxu3 %v110_v30 }
  0x13   :  { %121 = vmatpush.msra.mxu0 %v96_v21  ;;  %144 = vmatpush.msra.mxu1 %v112_v22 }
  0x14   :  { %210 = vmatpush.msra.mxu2 %v93_v34  ;;  %226 = vmatpush.msra.mxu3 %v109_v35 }
  0x15   :  { %122 = vmatpush.msra.mxu0 %v95_v23  ;;  %145 = vmatpush.msra.mxu1 %v111_v24 }
  0x16   :  { %211 = vmatpush.msra.mxu2 %v92_v36  ;;  %227 = vmatpush.msra.mxu3 %v108_v37 }
  0x17   :  { %123 = vmatpush.msra.mxu0 %v94_v26  ;;  %146 = vmatpush.msra.mxu1 %v110_v30 }
  0x18   :  { %262 = vset.pattern.permute.xlu0 %v292_v31  ;;  %212 = vmatpush.msra.mxu2 %v91_v38 }
  0x19   :  { %261 = vset.pattern.permute.xlu2 %v292_v31  ;;  %124 = vmatpush.msra.mxu0 %v93_v34 }
  0x1a   :  { %260 = vset.pattern.permute.xlu1 %v290_v5  ;;  %64 = vperm.xlu2 %261, %v16_v32  }
  0x1b   :  { %50 = vperm.xlu1 %260, %v20_v33   ;;  %147 = vmatpush.msra.mxu1 %v109_v35 }
  0x1c   :  { %125 = vmatpush.msra.mxu0 %v92_v36  ;;  %228 = vmatpush.msra.mxu3 %v107_v39 }
  0x1d   :  { %148 = vmatpush.msra.mxu1 %v108_v37  ;;  %213 = vmatpush.msra.mxu2 %v90_v40 }
  0x1e   :  { %126 = vmatpush.msra.mxu0 %v91_v38  ;;  %229 = vmatpush.msra.mxu3 %v106_v41 }
  0x1f   :  { %149 = vmatpush.msra.mxu1 %v107_v39  ;;  %214 = vmatpush.msra.mxu2 %v89_v42 }
  0x20   :  { %127 = vmatpush.msra.mxu0 %v90_v40  ;;  %230 = vmatpush.msra.mxu3 %v105_v43 }
  0x21   :  { %150 = vmatpush.msra.mxu1 %v106_v41  ;;  %215 = vmatpush.msra.mxu2 %v88_v44 }
  0x22   :  { %128 = vmatpush.msra.mxu0 %v89_v42  ;;  %231 = vmatpush.msra.mxu3 %v104_v45 }
  0x23   :  { %151 = vmatpush.msra.mxu1 %v105_v43  ;;  %216 = vmatpush.msra.mxu2 %v87_v46 }
  0x24   :  { %129 = vmatpush.msra.mxu0 %v88_v44  ;;  %232 = vmatpush.msra.mxu3 %v103_v47 }
  0x25   :  { %152 = vmatpush.msra.mxu1 %v104_v45  ;;  %217 = vmatpush.msra.mxu2 %v86_v48 }
  0x26   :  { %130 = vmatpush.msra.mxu0 %v87_v46  ;;  %233 = vmatpush.msra.mxu3 %v102_v49 }
  0x27   :  { %153 = vmatpush.msra.mxu1 %v103_v47  ;;  %218 = vmatpush.msra.mxu2 %v85_v50 }
  0x28   :  { %131 = vmatpush.msra.mxu0 %v86_v48  ;;  %234 = vmatpush.msra.mxu3 %v101_v51 }
  0x29   :  { %154 = vmatpush.msra.mxu1 %v102_v49 }
  0x2a   :  { %132 = vmatpush.msra.mxu0 %v85_v50 }
  0x2b   :  { %155 = vmatpush.msra.mxu1 %v101_v51 }
  0x62   :  { %v27_v53 = vpop.permute.xlu2 %26 }
  0x63   :  { %vm31_vm0 = vcmp.eq.s32.totalorder %v23_v56, %v27_v53 }
  0x6b   :  { %v37_v59 = vpop.permute.xlu2 %36 }
  0x6c   :  { %vm41_vm1 = vcmp.eq.s32.totalorder %v23_v56, %v37_v59 }
  0x74   :  { %v65_v62 = vpop.permute.xlu2 %64 }
  0x79   :  { %v30_v54 = vpop.permute.xlu0 %29 }
  0x7a   :  { %vm33_vm2 = vcmp.eq.s32.totalorder %v23_v56, %v30_v54  ;;  %vm34_vm5 = vcmp.eq.s32.totalorder %v24_v57, %v30_v54 }
  0x7b   :  { %v54_v55 = vpop.permute.xlu1 %53 }
  0x7c   :  { %vm57_vm7 = vcmp.eq.s32.totalorder %v23_v56, %v54_v55  ;;  %vm58_vm12 = vcmp.eq.s32.totalorder %v24_v57, %v54_v55 }
  0x82   :  { %v40_v58 = vpop.permute.xlu0 %39 }
  0x83   :  { %vm43_vm3 = vcmp.eq.s32.totalorder %v23_v56, %v40_v58  ;;  %vm44_vm4 = vcmp.eq.s32.totalorder %v24_v57, %v40_v58 }
  0x84   :  { %vm47_vm6 = vmor %vm33_vm2, %vm43_vm3  ;;  %v68_v60 = vpop.permute.xlu1 %67  ;;  %vm32_vm2 = vcmp.eq.s32.totalorder %v24_v57, %v27_v53  ;;  %vm42_vm3 = vcmp.eq.s32.totalorder %v24_v57, %v37_v59 }
  0x85   :  { %vm48_vm8 = vmor %vm34_vm5, %vm44_vm4  ;;  %vm71_vm9 = vcmp.eq.s32.totalorder %v23_v56, %v68_v60  ;;  %vm72_vm10 = vcmp.eq.s32.totalorder %v24_v57, %v68_v60 }
  0x86   :  { %vm61_vm11 = vmor %vm47_vm6, %vm57_vm7 }
  0x87   :  { %vm75_vm13 = vmor %vm61_vm11, %vm71_vm9  ;;  %vm69_vm9 = vcmp.eq.s32.totalorder %v23_v56, %v65_v62 }
  0x88   :  { %200 = vmatmul.msk.f32.vlgmr.msra.gmra.mxu2 %vm75_vm13, %v293_v61  ;;  %vm62_vm14 = vmor %vm48_vm8, %vm58_vm12  ;;  %vm70_vm13 = vcmp.eq.s32.totalorder %v24_v57, %v65_v62 }
  0x89   :  { %vm76_vm15 = vmor %vm62_vm14, %vm72_vm10  ;;  %vm171_vm14 = vcmask 39936  }
  0x8a   :  { %202 = vmatmul.msk.f32.vlgmr.msra.gmra.mxu3 %vm76_vm15, %v293_v61  ;;  %vm45_vm4 = vmor %vm31_vm0, %vm41_vm1  ;;  %vm174_vm15 = vcmask 154624  }
  0x8b   :  { %vm46_vm5 = vmor %vm32_vm2, %vm42_vm3 }
  0x8d   :  { %v51_v63 = vpop.permute.xlu1 %50 }
  0x8e   :  { %vm55_vm6 = vcmp.eq.s32.totalorder %v23_v56, %v51_v63  ;;  %vm56_vm7 = vcmp.eq.s32.totalorder %v24_v57, %v51_v63 }
  0x8f   :  { %vm59_vm11 = vmor %vm45_vm4, %vm55_vm6 }
  0x90   :  { %vm60_vm8 = vmor %vm46_vm5, %vm56_vm7 }
  0x91   :  { %vm73_vm12 = vmor %vm59_vm11, %vm69_vm9 }
  0x92   :  { %vm74_vm10 = vmor %vm60_vm8, %vm70_vm13  ;;  %199 = vmatmul.msk.f32.vlgmr.msra.gmra.mxu0 %vm73_vm12, %v293_v61 }
  0x93   :  { %201 = vmatmul.msk.f32.vlgmr.msra.gmra.mxu1 %vm74_vm10, %v293_v61 }
 0x10b   :  { %v137_v2 = vpop.f32.mrf.mxu2 }
 0x10d   :  { %v160_v3 = vpop.f32.mrf.mxu3 }
 0x10e   :  { %v161_v4 = vadd.f32 %v160_v3, %v137_v2 }
 0x10f   :  { %v134_v5 = vpop.f32.mrf.mxu0 }
 0x110   :  { %167 = vrot.lane.b32.xlu1 %v161_v4, %s294_s1  ;;  %v157_v6 = vpop.f32.mrf.mxu1 }
 0x111   :  { %v158_v7 = vadd.f32 %v157_v6, %v134_v5 }
 0x113   :  { %165 = vrot.lane.b32.xlu0 %v158_v7, %s294_s1 }
 0x182   :  { %v168_v8 = vpop.permute.xlu1 %167 }
 0x183   :  { %v173_v9 = vsel %vm171_vm14, %v316_v0, %v168_v8 }
 0x184   :  { %176 = vst.msk [vmem:[#allocation2 + $0x8] sm:$0xff] %vm174_vm15, %v173_v9 }
 0x185   :  { %v166_v10 = vpop.permute.xlu0 %165 }
 0x186   :  { %v172_v11 = vsel %vm171_vm14, %v321_v1, %v166_v10 }
 0x187   :  { %175 = vst.msk [vmem:[#allocation2] sm:$0xff] %vm174_vm15, %v172_v11 }
 0x188   :  { %189 = dma.vmem_to_hbm [thread:$0]  %s182_s19, 256, %s184_s22, [#allocation3], %s296_s23, %s296_s23, %s297_s24  }
 0x189   :  { %287 = dma.done.wait [#allocation3], 256  }
 0x18a   :  { %288 = vsyncadd [#allocation3], 4294967040 }
 0x18b   :  { %194 = vsyncpa [#allocation3], 1 }

</bundles_post_ra>
